<compile_context>
chip_gen: v5e
topology: v5e:2x2
jax: 0.10.0
libtpu: 0.0.40
codegen_flags: <defaults>
</compile_context>

<pallas_src>
import jax
import jax.numpy as jnp
from jax import lax
from jax.experimental import pallas as pl
from jax.experimental.pallas import tpu as pltpu


def _round_up(x, m):
    return (x + m - 1) // m * m


# ----------------------------------------------------------------------------
# Kernel 1: stats-only pass.  One MXU matmul (tile_m, K) x (K, C_pad), bf16 in,
# f32 accumulate; emits per-row-tile partial channel sums / sums-of-squares to
# DISTINCT output blocks so the grid axis is truly parallel.  The conv result
# itself is not written to HBM.
# ----------------------------------------------------------------------------
def _stats_kernel(x_ref, w_ref, sum_ref, sq_ref):
    acc = jnp.dot(x_ref[...], w_ref[...], preferred_element_type=jnp.float32)
    s = jnp.sum(acc, axis=0, keepdims=True)
    q = jnp.sum(acc * acc, axis=0, keepdims=True)
    # Broadcast across the 8 sublanes so the output block stays (8,128)-aligned.
    sum_ref[...] = jnp.broadcast_to(s, sum_ref.shape)
    sq_ref[...] = jnp.broadcast_to(q, sq_ref.shape)


# ----------------------------------------------------------------------------
# Kernel 2: fused conv (recomputed matmul) + BatchNorm affine + ReLU.
# One lane-dense (tile_m, C_pad) store per grid step.
# ----------------------------------------------------------------------------
def _conv_bn_relu_kernel(x_ref, w_ref, scale_ref, shift_ref, o_ref):
    acc = jnp.dot(x_ref[...], w_ref[...], preferred_element_type=jnp.float32)
    o_ref[...] = jnp.maximum(acc * scale_ref[...] + shift_ref[...], 0.0)


def conv_block_forward(x_nchw, weight, bias, gamma, beta, eps=1e-5):
    """x_nchw: (N, Cin, H, W) f32. weight: (3, 3, Cin, Cout) HWIO. -> (N, Cout, H, W)."""
    N, Cin, H, W = x_nchw.shape
    Cout = weight.shape[-1]
    K = 9 * Cin                       # contraction dim, NOT padded in HBM
    # TODO(synk): for production Cout >= 256, use 256-wide output tiles so the
    # v6e/v7x 256x256 MXUs are fully fed.
    C_pad = _round_up(Cout, 128)
    M = N * H * W

    # Conv bias cancels exactly under training-mode BatchNorm (it shifts the
    # per-channel mean by the same constant).  Only valid with batch stats;
    # eval-mode running stats would require applying it.
    del bias

    # Large lane-dense row tiles; pad M up to a tile multiple instead of
    # collapsing the whole problem into one giant block.
    tile_m = 1024 if M >= 1024 else _round_up(M, 8)
    M_pad = _round_up(M, tile_m)
    n_tiles = M_pad // tile_m

    # ---- layout plumbing (XLA): NCHW -> NHWC, pad=1 halo, im2col, bf16 cast.
    # TODO(synk): the remaining big lever is in-kernel im2col (halo row tiles +
    # pltpu.roll for the +-1 column shifts, 9 accumulating matmuls) to avoid the
    # 9x im2col HBM expansion entirely.
    x = jnp.transpose(x_nchw, (0, 2, 3, 1))
    xp = jnp.pad(x, ((0, 0), (1, 1), (1, 1), (0, 0)))
    patches = [xp[:, dy:dy + H, dx:dx + W, :] for dy in range(3) for dx in range(3)]
    im2col = jnp.concatenate(patches, axis=-1).reshape(M, K)
    im2col = jnp.pad(im2col, ((0, M_pad - M), (0, 0))).astype(jnp.bfloat16)

    w2d = jnp.pad(weight.reshape(K, Cout),
                  ((0, 0), (0, C_pad - Cout))).astype(jnp.bfloat16)

    vmem_cap = 32 * 1024 * 1024  # explicit: v5e scoped default is 16 MiB; safe on v7x (64 MiB)

    # ---- Pass 1: batch statistics (per-tile partial sums).
    stats_fn = pl.pallas_call(
        _stats_kernel,
        out_shape=(
            jax.ShapeDtypeStruct((n_tiles * 8, C_pad), jnp.float32),
            jax.ShapeDtypeStruct((n_tiles * 8, C_pad), jnp.float32),
        ),
        grid_spec=pltpu.PrefetchScalarGridSpec(
            num_scalar_prefetch=0,
            grid=(n_tiles,),
            in_specs=[
                pl.BlockSpec((tile_m, K), lambda i: (i, 0)),
                pl.BlockSpec((K, C_pad), lambda i: (0, 0)),
            ],
            out_specs=[
                pl.BlockSpec((8, C_pad), lambda i: (i, 0)),
                pl.BlockSpec((8, C_pad), lambda i: (i, 0)),
            ],
        ),
        compiler_params=pltpu.CompilerParams(
            dimension_semantics=("parallel",),
            vmem_limit_bytes=vmem_cap),
    )
    psum, psq = stats_fn(im2col, w2d)

    # Finish the tiny (n_tiles, C_pad) reduction in the wrapper.
    csum = psum.reshape(n_tiles, 8, C_pad)[:, 0, :].sum(axis=0)
    csq = psq.reshape(n_tiles, 8, C_pad)[:, 0, :].sum(axis=0)

    # BatchNorm2d (training mode): biased batch statistics over (N, H, W).
    count = jnp.float32(M)
    mean = csum / count
    # TODO(synk): E[x^2]-E[x]^2 (clamped at 0) is cancellation-prone at large
    # activation magnitudes; prefer a two-pass/Welford variance in production.
    var = jnp.maximum(csq / count - mean * mean, 0.0)

    gamma_p = jnp.pad(gamma.astype(jnp.float32), (0, C_pad - Cout))
    beta_p = jnp.pad(beta.astype(jnp.float32), (0, C_pad - Cout))
    inv_std = lax.rsqrt(var + eps)
    scale = (gamma_p * inv_std).reshape(1, C_pad)
    shift = (beta_p - mean * gamma_p * inv_std).reshape(1, C_pad)

    # ---- Pass 2: conv (recomputed) + BN affine + ReLU, fused.
    fused_fn = pl.pallas_call(
        _conv_bn_relu_kernel,
        out_shape=jax.ShapeDtypeStruct((M_pad, C_pad), jnp.float32),
        grid_spec=pltpu.PrefetchScalarGridSpec(
            num_scalar_prefetch=0,
            grid=(n_tiles,),
            in_specs=[
                pl.BlockSpec((tile_m, K), lambda i: (i, 0)),
                pl.BlockSpec((K, C_pad), lambda i: (0, 0)),
                pl.BlockSpec((1, C_pad), lambda i: (0, 0)),
                pl.BlockSpec((1, C_pad), lambda i: (0, 0)),
            ],
            out_specs=pl.BlockSpec((tile_m, C_pad), lambda i: (i, 0)),
        ),
        compiler_params=pltpu.CompilerParams(
            dimension_semantics=("parallel",),
            vmem_limit_bytes=vmem_cap),
    )
    out_flat = fused_fn(im2col, w2d, scale, shift)

    # Un-pad + NHWC->NCHW transpose left to XLA (NCHW last dim W < 128, so an
    # in-kernel NCHW store could not be lane-dense anyway).
    out = out_flat[:M, :Cout].reshape(N, H, W, Cout)
    return jnp.transpose(out, (0, 3, 1, 2))


def _reference(x_nchw, weight, bias, gamma, beta, eps=1e-5):
    """Pure-JAX f32 reference (conv via lax, BN training-mode, ReLU)."""
    x = jnp.transpose(x_nchw, (0, 2, 3, 1))
    y = lax.conv_general_dilated(
        x, weight, window_strides=(1, 1), padding=((1, 1), (1, 1)),
        dimension_numbers=("NHWC", "HWIO", "NHWC")) + bias
    mean = jnp.mean(y, axis=(0, 1, 2))
    var = jnp.mean((y - mean) ** 2, axis=(0, 1, 2))
    y = (y - mean) / jnp.sqrt(var + eps) * gamma + beta
    y = jnp.maximum(y, 0.0)
    return jnp.transpose(y, (0, 3, 1, 2))


if __name__ == "__main__":
    # Small shapes consistent with ConvBlock(in_channels=4, out_channels=8).
    N, Cin, Cout, H, W = 2, 4, 8, 16, 16

    key = jax.random.PRNGKey(0)
    kx, kw, kb = jax.random.split(key, 3)

    x = jax.random.normal(kx, (N, Cin, H, W), dtype=jnp.float32)
    # Conv weight in HWIO layout (3, 3, Cin, Cout); bias (Cout,).
    weight = jax.random.normal(kw, (3, 3, Cin, Cout), dtype=jnp.float32) * 0.1
    bias = jax.random.normal(kb, (Cout,), dtype=jnp.float32) * 0.1
    # BatchNorm affine params: PyTorch defaults (gamma=1, beta=0).
    gamma = jnp.ones((Cout,), dtype=jnp.float32)
    beta = jnp.zeros((Cout,), dtype=jnp.float32)

    out = conv_block_forward(x, weight, bias, gamma, beta)
    out = jax.block_until_ready(out)

    ref = _reference(x, weight, bias, gamma, beta)
    assert out.shape == (N, Cout, H, W)
    # bf16 MXU inputs (per perf review) -> loosened tolerance vs f32 reference.
    assert jnp.allclose(out, ref, atol=2e-2, rtol=2e-2), "mismatch vs reference"

    print("KERNEL_OK")
</pallas_src>

<mosaic_0001>
module attributes {stable_mosaic.version = 11 : i64} {
  func.func @_stats_kernel(%arg0: i32, %arg1: memref<512x36xbf16, #tpu.memory_space<vmem>>, %arg2: memref<36x128xbf16, #tpu.memory_space<vmem>>, %arg3: memref<8x128xf32, #tpu.memory_space<vmem>>, %arg4: memref<8x128xf32, #tpu.memory_space<vmem>>) attributes {dimension_semantics = [#tpu.dimension_semantics<parallel>], iteration_bounds = array<i64: 1>, scalar_prefetch = 0 : i64, scratch_operands = 0 : i64, tpu.core_type = #tpu.core_type<tc>, window_params = [{transform_indices = @transform_0, window_bounds = array<i64: 512, 36>}, {pipeline_mode = #tpu.pipeline_mode<synchronous>, transform_indices = @transform_1, window_bounds = array<i64: 36, 128>}, {transform_indices = @transform_2, window_bounds = array<i64: 8, 128>}, {transform_indices = @transform_3, window_bounds = array<i64: 8, 128>}]} {
    %c0 = arith.constant 0 : index
    %c0_0 = arith.constant 0 : index
    %0 = vector.load %arg1[%c0, %c0_0] : memref<512x36xbf16, #tpu.memory_space<vmem>>, vector<512x36xbf16>
    %c0_1 = arith.constant 0 : index
    %c0_2 = arith.constant 0 : index
    %1 = vector.load %arg2[%c0_1, %c0_2] : memref<36x128xbf16, #tpu.memory_space<vmem>>, vector<36x128xbf16>
    %cst = arith.constant dense<0.000000e+00> : vector<512x128xf32>
    %2 = tpu.matmul %0, %1, %cst {dimension_numbers = #tpu.dot_dimension_numbers<[1], [0], [0], [1], [0, 0, 1, 1], [], []>} : vector<512x36xbf16>, vector<36x128xbf16>, vector<512x128xf32> -> vector<512x128xf32>
    %cst_3 = arith.constant dense<0.000000e+00> : vector<128xf32>
    %3 = vector.multi_reduction <add>, %2, %cst_3 [0] : vector<512x128xf32> to vector<128xf32>
    %4 = vector.shape_cast %3 : vector<128xf32> to vector<1x128xf32>
    %5 = arith.mulf %2, %2 : vector<512x128xf32>
    %cst_4 = arith.constant dense<0.000000e+00> : vector<128xf32>
    %6 = vector.multi_reduction <add>, %5, %cst_4 [0] : vector<512x128xf32> to vector<128xf32>
    %7 = vector.shape_cast %6 : vector<128xf32> to vector<1x128xf32>
    %8 = vector.shape_cast %4 : vector<1x128xf32> to vector<1x128xf32>
    %9 = vector.broadcast %8 : vector<1x128xf32> to vector<8x128xf32>
    %c0_5 = arith.constant 0 : index
    %c0_6 = arith.constant 0 : index
    %10 = vector.load %arg3[%c0_5, %c0_6] : memref<8x128xf32, #tpu.memory_space<vmem>>, vector<8x128xf32>
    tpu.vector_store %arg3[%c0_5, %c0_6], %9 {strides = array<i32>} : memref<8x128xf32, #tpu.memory_space<vmem>>, vector<8x128xf32>,
    %11 = vector.shape_cast %7 : vector<1x128xf32> to vector<1x128xf32>
    %12 = vector.broadcast %11 : vector<1x128xf32> to vector<8x128xf32>
    %c0_7 = arith.constant 0 : index
    %c0_8 = arith.constant 0 : index
    %13 = vector.load %arg4[%c0_7, %c0_8] : memref<8x128xf32, #tpu.memory_space<vmem>>, vector<8x128xf32>
    tpu.vector_store %arg4[%c0_7, %c0_8], %12 {strides = array<i32>} : memref<8x128xf32, #tpu.memory_space<vmem>>, vector<8x128xf32>,
    return
  }
  func.func @transform_0(%arg0: i32) -> (i32, i32) {
    %c0_i32 = arith.constant 0 : i32
    %c0_i32_0 = arith.constant 0 : i32
    return %arg0, %c0_i32 : i32, i32
  }
  func.func @transform_1(%arg0: i32) -> (i32, i32) {
    %c0_i32 = arith.constant 0 : i32
    %c0_i32_0 = arith.constant 0 : i32
    %c0_i32_1 = arith.constant 0 : i32
    return %c0_i32, %c0_i32_0 : i32, i32
  }
  func.func @transform_2(%arg0: i32) -> (i32, i32) {
    %c0_i32 = arith.constant 0 : i32
    %c0_i32_0 = arith.constant 0 : i32
    return %arg0, %c0_i32 : i32, i32
  }
  func.func @transform_3(%arg0: i32) -> (i32, i32) {
    %c0_i32 = arith.constant 0 : i32
    %c0_i32_0 = arith.constant 0 : i32
    return %arg0, %c0_i32 : i32, i32
  }
}

</mosaic_0001>

<bundles_post_ra>
// kernel: tpu_custom_call.1
= control target key start
LH: loop header
LB: loop body
LE: loop exit
PB: predicated region body
PF: predicated region fallthrough
CT: control target
= control target key end

     0   :  { %9 = vsyncpa [#allocation3], 0  ;;  %vm357_vm0 = vcmask 1041408   ;;  %s1366_s0 = inlined_call_operand.vmem [shape: bf16[512,36], index: 0, kind: input, shape index: {}]   ;;  %s1367_s1 = inlined_call_operand.vmem [shape: bf16[36,128], index: 1, kind: input, shape index: {}]   ;;  %s1368_s2 = inlined_call_operand.hbm [shape: f32[8,128], index: 2, kind: output, shape index: {0}]   ;;  %s1369_s3 = inlined_call_operand.hbm [shape: f32[8,128], index: 3, kind: output, shape index: {1}]  }
   0x1   :  { %v84_v0 = vld [vmem:[%s1367_s1 + $0x10] sm:$0x3] }
   0x2   :  { %v254_v1 = vunpack.c.l.b16 %v84_v0 }
   0x3   :  { %10 = vsyncpa [#allocation5], 0  ;;  %v967_v4 = vld [vmem:[%s1367_s1 + $0x8] sm:$0xff]  ;;  %v966_v5 = vld [vmem:[%s1367_s1] sm:$0xff]  ;;  %vm260_vm1 = vcmask 293888   ;;  %s741_s28 = sshll.u32 %s1368_s2, 4  ;;  %s742_s28 = int_to_ptr.hbm [resolvable:$true] %s741_s28 }
   0x4   :  { %v257_v2 = vpack.c.b16 %v254_v1, %v254_v1  ;;  %v934_v6 = vld [vmem:[%s1366_s0] sm:$0xff]  ;;  %v935_v8 = vld [vmem:[%s1366_s0 + $0x8] sm:$0xff]  ;;  %v936_v11 = vld [vmem:[%s1366_s0 + $0x10] sm:$0xff]  ;;  %s1032_s29 = smov [#allocation4]   ;;  %s752_s6 = sshll.u32 %s1369_s3, 4  ;;  %s753_s6 = int_to_ptr.hbm [resolvable:$true] %s752_s6 }
   0x5   :  { %v942_v7 = vld [vmem:[%s1366_s0 + $0x40] sm:$0xff]  ;;  %v943_v9 = vld [vmem:[%s1366_s0 + $0x48] sm:$0xff]  ;;  %v944_v12 = vld [vmem:[%s1366_s0 + $0x50] sm:$0xff]  ;;  %s750_s30 = sshll.u32 %s1032_s29, 4  ;;  %s751_s30 = int_to_ptr.vmem [resolvable:$true] %s750_s30 }
   0x6   :  { %v359_v3 = vsel %vm357_vm0, %v257_v2, 0  ;;  %v950_v10 = vld [vmem:[%s1366_s0 + $0x80] sm:$0xff]  ;;  %v951_v13 = vld [vmem:[%s1366_s0 + $0x88] sm:$0xff]  ;;  %v937_v14 = vld [vmem:[%s1366_s0 + $0x18] sm:$0xff] }
   0x7   :  { %366 = vmatpush.bf16.msra.mxu0 %v359_v3  ;;  %968 = vmatpush.bf16.msra.mxu1 %v359_v3  ;;  %v945_v15 = vld [vmem:[%s1366_s0 + $0x58] sm:$0xff]  ;;  %v952_v16 = vld [vmem:[%s1366_s0 + $0x90] sm:$0xff]  ;;  %v958_v17 = vld [vmem:[%s1366_s0 + $0xc0] sm:$0xff] }
   0x8   :  { %969 = vmatpush.bf16.msra.mxu2 %v359_v3  ;;  %970 = vmatpush.bf16.msra.mxu3 %v359_v3  ;;  %v938_v18 = vld [vmem:[%s1366_s0 + $0x20] sm:$0xff]  ;;  %v953_v20 = vld [vmem:[%s1366_s0 + $0x98] sm:$0xff]  ;;  %v959_v21 = vld [vmem:[%s1366_s0 + $0xc8] sm:$0xff] }
   0x9   :  { %v946_v19 = vld [vmem:[%s1366_s0 + $0x60] sm:$0xff]  ;;  %v939_v22 = vld [vmem:[%s1366_s0 + $0x28] sm:$0xff]  ;;  %v960_v25 = vld [vmem:[%s1366_s0 + $0xd0] sm:$0xff] }
   0xa   :  { %v947_v23 = vld [vmem:[%s1366_s0 + $0x68] sm:$0xff]  ;;  %v954_v24 = vld [vmem:[%s1366_s0 + $0xa0] sm:$0xff]  ;;  %v940_v26 = vld [vmem:[%s1366_s0 + $0x30] sm:$0xff] }
   0xb   :  { %367 = vmatpush.bf16.msra.mxu0 %v967_v4  ;;  %971 = vmatpush.bf16.msra.mxu1 %v967_v4  ;;  %v948_v27 = vld [vmem:[%s1366_s0 + $0x70] sm:$0xff]  ;;  %v955_v28 = vld [vmem:[%s1366_s0 + $0xa8] sm:$0xff]  ;;  %v961_v29 = vld [vmem:[%s1366_s0 + $0xd8] sm:$0xff] }
   0xc   :  { %972 = vmatpush.bf16.msra.mxu2 %v967_v4  ;;  %973 = vmatpush.bf16.msra.mxu3 %v967_v4  ;;  %v941_v30 = vld [vmem:[%s1366_s0 + $0x38] sm:$0xff]  ;;  %v956_v32 = vld [vmem:[%s1366_s0 + $0xb0] sm:$0xff]  ;;  %v962_v33 = vld [vmem:[%s1366_s0 + $0xe0] sm:$0xff] }
   0xd   :  { %v949_v31 = vld [vmem:[%s1366_s0 + $0x78] sm:$0xff]  ;;  %v963_v37 = vld [vmem:[%s1366_s0 + $0xe8] sm:$0xff]  ;;  %v964_v48 = vld [vmem:[%s1366_s0 + $0xf0] sm:$0xff] }
   0xe   :  { %v957_v36 = vld [vmem:[%s1366_s0 + $0xb8] sm:$0xff] }
   0xf   :  { %368 = vmatpush.bf16.msra.mxu0 %v966_v5  ;;  %974 = vmatpush.bf16.msra.mxu1 %v966_v5  ;;  %v965_v60 = vld [vmem:[%s1366_s0 + $0xf8] sm:$0xff]  ;;  %s1031_s0 = smov [#allocation2]  }
  0x10   :  { %975 = vmatpush.bf16.msra.mxu2 %v966_v5  ;;  %976 = vmatpush.bf16.msra.mxu3 %v966_v5  ;;  %s739_s25 = sshll.u32 %s1031_s0, 4  ;;  %s740_s25 = int_to_ptr.vmem [resolvable:$true] %s739_s25 }
  0x12   :  { %902 = vmatmul.msk.bf16.vlgmr.msra.gmra.mxu0 %vm260_vm1, %v934_v6  ;;  %910 = vmatmul.msk.bf16.vlgmr.msra.gmra.mxu1 %vm260_vm1, %v942_v7 }
  0x13   :  { %918 = vmatmul.msk.bf16.vlgmr.msra.gmra.mxu2 %vm260_vm1, %v950_v10  ;;  %926 = vmatmul.msk.bf16.vlgmr.msra.gmra.mxu3 %vm260_vm1, %v958_v17 }
  0x22   :  { %903 = vmatmul.msk.bf16.gmra.mxu0 %vm260_vm1, %v935_v8  ;;  %911 = vmatmul.msk.bf16.gmra.mxu1 %vm260_vm1, %v943_v9 }
  0x23   :  { %919 = vmatmul.msk.bf16.gmra.mxu2 %vm260_vm1, %v951_v13  ;;  %927 = vmatmul.msk.bf16.gmra.mxu3 %vm260_vm1, %v959_v21 }
  0x32   :  { %904 = vmatmul.msk.bf16.gmra.mxu0 %vm260_vm1, %v936_v11  ;;  %912 = vmatmul.msk.bf16.gmra.mxu1 %vm260_vm1, %v944_v12 }
  0x33   :  { %920 = vmatmul.msk.bf16.gmra.mxu2 %vm260_vm1, %v952_v16  ;;  %928 = vmatmul.msk.bf16.gmra.mxu3 %vm260_vm1, %v960_v25 }
  0x42   :  { %905 = vmatmul.msk.bf16.gmra.mxu0 %vm260_vm1, %v937_v14  ;;  %913 = vmatmul.msk.bf16.gmra.mxu1 %vm260_vm1, %v945_v15 }
  0x43   :  { %921 = vmatmul.msk.bf16.gmra.mxu2 %vm260_vm1, %v953_v20  ;;  %929 = vmatmul.msk.bf16.gmra.mxu3 %vm260_vm1, %v961_v29 }
  0x52   :  { %906 = vmatmul.msk.bf16.gmra.mxu0 %vm260_vm1, %v938_v18  ;;  %914 = vmatmul.msk.bf16.gmra.mxu1 %vm260_vm1, %v946_v19 }
  0x53   :  { %922 = vmatmul.msk.bf16.gmra.mxu2 %vm260_vm1, %v954_v24  ;;  %930 = vmatmul.msk.bf16.gmra.mxu3 %vm260_vm1, %v962_v33 }
  0x62   :  { %907 = vmatmul.msk.bf16.gmra.mxu0 %vm260_vm1, %v939_v22  ;;  %915 = vmatmul.msk.bf16.gmra.mxu1 %vm260_vm1, %v947_v23 }
  0x63   :  { %923 = vmatmul.msk.bf16.gmra.mxu2 %vm260_vm1, %v955_v28  ;;  %931 = vmatmul.msk.bf16.gmra.mxu3 %vm260_vm1, %v963_v37 }
  0x72   :  { %908 = vmatmul.msk.bf16.gmra.mxu0 %vm260_vm1, %v940_v26  ;;  %916 = vmatmul.msk.bf16.gmra.mxu1 %vm260_vm1, %v948_v27 }
  0x73   :  { %924 = vmatmul.msk.bf16.gmra.mxu2 %vm260_vm1, %v956_v32  ;;  %932 = vmatmul.msk.bf16.gmra.mxu3 %vm260_vm1, %v964_v48 }
  0x82   :  { %909 = vmatmul.msk.bf16.gmra.mxu0 %vm260_vm1, %v941_v30  ;;  %917 = vmatmul.msk.bf16.gmra.mxu1 %vm260_vm1, %v949_v31 }
  0x83   :  { %925 = vmatmul.msk.bf16.gmra.mxu2 %vm260_vm1, %v957_v36  ;;  %933 = vmatmul.msk.bf16.gmra.mxu3 %vm260_vm1, %v965_v60 }
  0x8f   :  { %v370_v34 = vpop.f32.mrf.mxu0  ;;  %v1174_v35 = vpop.f32.mrf.mxu1 }
  0x90   :  { %v599_v39 = vmul.f32 %v370_v34, %v370_v34 }
  0x96   :  { %v1194_v56 = vpop.f32.mrf.mxu2  ;;  %v1212_v7 = vpop.f32.mrf.mxu3 }
  0x97   :  { %v372_v38 = vpop.f32.mrf.mxu0  ;;  %v1184_v42 = vpop.f32.mrf.mxu1 }
  0x98   :  { %v530_v40 = vadd.f32 %v372_v38, %v370_v34  ;;  %v600_v41 = vmul.f32 %v372_v38, %v372_v38 }
  0x9a   :  { %v663_v43 = vadd.f32 %v600_v41, %v599_v39 }
  0x9e   :  { %v1202_v63 = vpop.f32.mrf.mxu2  ;;  %v1218_v11 = vpop.f32.mrf.mxu3 }
  0x9f   :  { %v375_v44 = vpop.f32.mrf.mxu0  ;;  %v1189_v49 = vpop.f32.mrf.mxu1 }
  0xa0   :  { %v531_v45 = vadd.f32 %v530_v40, %v375_v44  ;;  %v601_v46 = vmul.f32 %v375_v44, %v375_v44 }
  0xa2   :  { %v664_v47 = vadd.f32 %v663_v43, %v601_v46 }
  0xa6   :  { %v1206_v2 = vpop.f32.mrf.mxu2  ;;  %v1224_v15 = vpop.f32.mrf.mxu3 }
  0xa7   :  { %v377_v50 = vpop.f32.mrf.mxu0  ;;  %v1192_v54 = vpop.f32.mrf.mxu1 }
  0xa8   :  { %v532_v51 = vadd.f32 %v531_v45, %v377_v50  ;;  %v602_v52 = vmul.f32 %v377_v50, %v377_v50 }
  0xaa   :  { %v665_v53 = vadd.f32 %v664_v47, %v602_v52 }
  0xae   :  { %v1210_v5 = vpop.f32.mrf.mxu2  ;;  %v1230_v19 = vpop.f32.mrf.mxu3 }
  0xaf   :  { %v380_v55 = vpop.f32.mrf.mxu0  ;;  %v1200_v62 = vpop.f32.mrf.mxu1 }
  0xb0   :  { %v533_v57 = vadd.f32 %v532_v51, %v380_v55  ;;  %v603_v58 = vmul.f32 %v380_v55, %v380_v55 }
  0xb2   :  { %v666_v59 = vadd.f32 %v665_v53, %v603_v58 }
  0xb6   :  { %v1216_v10 = vpop.f32.mrf.mxu2  ;;  %v1236_v30 = vpop.f32.mrf.mxu3 }
  0xb7   :  { %v382_v61 = vpop.f32.mrf.mxu0  ;;  %v1204_v1 = vpop.f32.mrf.mxu1 }
  0xb8   :  { %v604_v21 = vmul.f32 %v382_v61, %v382_v61  ;;  %v534_v23 = vadd.f32 %v533_v57, %v382_v61 }
  0xba   :  { %v667_v26 = vadd.f32 %v666_v59, %v604_v21 }
  0xbe   :  { %v1222_v14 = vpop.f32.mrf.mxu2  ;;  %v1242_v52 = vpop.f32.mrf.mxu3 }
  0xbf   :  { %v385_v0 = vpop.f32.mrf.mxu0  ;;  %v1208_v4 = vpop.f32.mrf.mxu1 }
  0xc0   :  { %v605_v24 = vmul.f32 %v385_v0, %v385_v0  ;;  %v535_v27 = vadd.f32 %v534_v23, %v385_v0 }
  0xc2   :  { %v668_v31 = vadd.f32 %v667_v26, %v605_v24 }
  0xc6   :  { %v1228_v18 = vpop.f32.mrf.mxu2 }
  0xc7   :  { %v387_v3 = vpop.f32.mrf.mxu0  ;;  %v1214_v8 = vpop.f32.mrf.mxu1 }
  0xc8   :  { %v606_v28 = vmul.f32 %v387_v3, %v387_v3  ;;  %v536_v32 = vadd.f32 %v535_v27, %v387_v3  ;;  %v616_v27 = vmul.f32 %v1184_v42, %v1184_v42 }
  0xca   :  { %v669_v34 = vadd.f32 %v668_v31, %v606_v28  ;;  %v617_v31 = vmul.f32 %v1189_v49, %v1189_v49 }
  0xce   :  { %v1234_v25 = vpop.f32.mrf.mxu2 }
  0xcf   :  { %v390_v6 = vpop.f32.mrf.mxu0  ;;  %v1220_v13 = vpop.f32.mrf.mxu1 }
  0xd0   :  { %v607_v33 = vmul.f32 %v390_v6, %v390_v6  ;;  %v537_v36 = vadd.f32 %v536_v32, %v390_v6 }
  0xd2   :  { %v670_v38 = vadd.f32 %v669_v34, %v607_v33  ;;  %v618_v34 = vmul.f32 %v1192_v54, %v1192_v54 }
  0xd6   :  { %v1240_v47 = vpop.f32.mrf.mxu2 }
  0xd7   :  { %v392_v9 = vpop.f32.mrf.mxu0  ;;  %v1226_v17 = vpop.f32.mrf.mxu1 }
  0xd8   :  { %v608_v37 = vmul.f32 %v392_v9, %v392_v9  ;;  %v538_v39 = vadd.f32 %v537_v36, %v392_v9 }
  0xda   :  { %v671_v43 = vadd.f32 %v670_v38, %v608_v37  ;;  %v619_v38 = vmul.f32 %v1200_v62, %v1200_v62 }
  0xde   :  { %v1244_v23 = vpop.f32.mrf.mxu2 }
  0xdf   :  { %v395_v12 = vpop.f32.mrf.mxu0  ;;  %v1232_v22 = vpop.f32.mrf.mxu1 }
  0xe0   :  { %v609_v40 = vmul.f32 %v395_v12, %v395_v12  ;;  %v539_v44 = vadd.f32 %v538_v39, %v395_v12 }
  0xe2   :  { %v672_v48 = vadd.f32 %v671_v43, %v609_v40  ;;  %v620_v43 = vmul.f32 %v1204_v1, %v1204_v1 }
  0xe6   :  { %v1263_v40 = vpop.f32.mrf.mxu2 }
  0xe7   :  { %v397_v16 = vpop.f32.mrf.mxu0  ;;  %v1238_v41 = vpop.f32.mrf.mxu1 }
  0xe8   :  { %v610_v45 = vmul.f32 %v397_v16, %v397_v16  ;;  %v540_v50 = vadd.f32 %v539_v44, %v397_v16  ;;  %v615_v16 = vmul.f32 %v1174_v35, %v1174_v35 }
  0xea   :  { %v673_v53 = vadd.f32 %v672_v48, %v610_v45 }
  0xef   :  { %v400_v20 = vpop.f32.mrf.mxu0  ;;  %v440_v6 = vpop.f32.mrf.mxu1 }
  0xf0   :  { %v611_v51 = vmul.f32 %v400_v20, %v400_v20  ;;  %v541_v55 = vadd.f32 %v540_v50, %v400_v20  ;;  %v1249_v20 = vpop.f32.mrf.mxu3 }
  0xf2   :  { %v674_v58 = vadd.f32 %v673_v53, %v611_v51  ;;  %v623_v53 = vmul.f32 %v1220_v13, %v1220_v13 }
  0xf7   :  { %v402_v29 = vpop.f32.mrf.mxu0  ;;  %v442_v37 = vpop.f32.mrf.mxu1 }
  0xf8   :  { %v612_v57 = vmul.f32 %v402_v29, %v402_v29  ;;  %v542_v59 = vadd.f32 %v541_v55, %v402_v29  ;;  %v1268_v45 = vpop.f32.mrf.mxu3 }
  0xfa   :  { %v675_v61 = vadd.f32 %v674_v58, %v612_v57  ;;  %v624_v58 = vmul.f32 %v1226_v17, %v1226_v17 }
  0xff   :  { %v405_v46 = vpop.f32.mrf.mxu0  ;;  %v445_v57 = vpop.f32.mrf.mxu1 }
 0x100   :  { %v613_v60 = vmul.f32 %v405_v46, %v405_v46  ;;  %v543_v0 = vadd.f32 %v542_v59, %v405_v46 }
 0x102   :  { %v676_v9 = vadd.f32 %v675_v61, %v613_v60  ;;  %v625_v61 = vmul.f32 %v1232_v22, %v1232_v22 }
 0x107   :  { %v407_v3 = vpop.f32.mrf.mxu0 }
 0x108   :  { %v544_v12 = vadd.f32 %v543_v0, %v407_v3  ;;  %v614_v21 = vmul.f32 %v407_v3, %v407_v3  ;;  %v1285_v3 = vpop.f32.mrf.mxu3 }
 0x10a   :  { %v545_v24 = vadd.f32 %v544_v12, %v1174_v35  ;;  %v677_v26 = vadd.f32 %v676_v9, %v614_v21 }
 0x10c   :  { %v546_v28 = vadd.f32 %v545_v24, %v1184_v42  ;;  %v678_v29 = vadd.f32 %v677_v26, %v615_v16  ;;  %v627_v16 = vmul.f32 %v440_v6, %v440_v6 }
 0x10e   :  { %v547_v32 = vadd.f32 %v546_v28, %v1189_v49  ;;  %v679_v33 = vadd.f32 %v678_v29, %v616_v27  ;;  %v628_v27 = vmul.f32 %v442_v37, %v442_v37  ;;  %v447_v28 = vpop.f32.mrf.mxu1 }
 0x110   :  { %v548_v35 = vadd.f32 %v547_v32, %v1192_v54  ;;  %v680_v36 = vadd.f32 %v679_v33, %v617_v31  ;;  %v621_v54 = vmul.f32 %v1208_v4, %v1208_v4  ;;  %v629_v32 = vmul.f32 %v445_v57, %v445_v57 }
 0x112   :  { %v549_v39 = vadd.f32 %v548_v35, %v1200_v62  ;;  %v681_v42 = vadd.f32 %v680_v36, %v618_v34  ;;  %v622_v62 = vmul.f32 %v1214_v8, %v1214_v8  ;;  %v630_v35 = vmul.f32 %v447_v28, %v447_v28  ;;  %v1290_v36 = vpop.f32.mrf.mxu3 }
 0x114   :  { %v550_v49 = vadd.f32 %v549_v39, %v1204_v1  ;;  %v682_v44 = vadd.f32 %v681_v42, %v619_v38  ;;  %v632_v39 = vmul.f32 %v1202_v63, %v1202_v63 }
 0x116   :  { %v683_v46 = vadd.f32 %v682_v44, %v620_v43  ;;  %v551_v48 = vadd.f32 %v550_v49, %v1208_v4  ;;  %v477_v4 = vpop.f32.mrf.mxu2  ;;  %v633_v43 = vmul.f32 %v1206_v2, %v1206_v2 }
 0x118   :  { %v552_v50 = vadd.f32 %v551_v48, %v1214_v8  ;;  %v684_v51 = vadd.f32 %v683_v46, %v621_v54  ;;  %v634_v54 = vmul.f32 %v1210_v5, %v1210_v5 }
 0x11a   :  { %v553_v1 = vadd.f32 %v552_v50, %v1220_v13  ;;  %v685_v55 = vadd.f32 %v684_v51, %v622_v62  ;;  %v626_v13 = vmul.f32 %v1238_v41, %v1238_v41  ;;  %v635_v62 = vmul.f32 %v1216_v10, %v1216_v10  ;;  %v1307_v51 = vpop.f32.mrf.mxu3 }
 0x11c   :  { %v554_v59 = vadd.f32 %v553_v1, %v1226_v17  ;;  %v686_v60 = vadd.f32 %v685_v55, %v623_v53  ;;  %v636_v53 = vmul.f32 %v1222_v14, %v1222_v14  ;;  %v637_v55 = vmul.f32 %v1228_v18, %v1228_v18 }
 0x11e   :  { %v555_v8 = vadd.f32 %v554_v59, %v1232_v22  ;;  %v687_v0 = vadd.f32 %v686_v60, %v624_v58  ;;  %v480_v22 = vpop.f32.mrf.mxu2  ;;  %v638_v58 = vmul.f32 %v1234_v25, %v1234_v25  ;;  %v639_v60 = vmul.f32 %v1240_v47, %v1240_v47 }
 0x120   :  { %v556_v9 = vadd.f32 %v555_v8, %v1238_v41  ;;  %v688_v12 = vadd.f32 %v687_v0, %v625_v61  ;;  %v631_v41 = vmul.f32 %v1194_v56, %v1194_v56  ;;  %v640_v0 = vmul.f32 %v1244_v23, %v1244_v23 }
 0x122   :  { %v557_v21 = vadd.f32 %v556_v9, %v440_v6  ;;  %v689_v24 = vadd.f32 %v688_v12, %v626_v13  ;;  %v641_v12 = vmul.f32 %v1263_v40, %v1263_v40 }
 0x124   :  { %v690_v17 = vadd.f32 %v689_v24, %v627_v16  ;;  %v558_v26 = vadd.f32 %v557_v21, %v442_v37  ;;  %v642_v24 = vmul.f32 %v477_v4, %v477_v4 }
 0x126   :  { %v691_v29 = vadd.f32 %v690_v17, %v628_v27  ;;  %v559_v31 = vadd.f32 %v558_v26, %v445_v57  ;;  %v643_v27 = vmul.f32 %v480_v22, %v480_v22 }
 0x128   :  { %v692_v33 = vadd.f32 %v691_v29, %v629_v32  ;;  %v560_v34 = vadd.f32 %v559_v31, %v447_v28 }
 0x12a   :  { %v561_v38 = vadd.f32 %v560_v34, %v1194_v56  ;;  %v693_v6 = vadd.f32 %v692_v33, %v630_v35  ;;  %v482_v56 = vpop.f32.mrf.mxu2 }
 0x12b   :  { %v644_v31 = vmul.f32 %v482_v56, %v482_v56 }
 0x12c   :  { %v562_v37 = vadd.f32 %v561_v38, %v1202_v63  ;;  %v694_v42 = vadd.f32 %v693_v6, %v631_v41 }
 0x12e   :  { %v563_v49 = vadd.f32 %v562_v37, %v1206_v2  ;;  %v695_v44 = vadd.f32 %v694_v42, %v632_v39 }
 0x130   :  { %v564_v46 = vadd.f32 %v563_v49, %v1210_v5  ;;  %v696_v48 = vadd.f32 %v695_v44, %v633_v43  ;;  %v649_v43 = vmul.f32 %v1224_v15, %v1224_v15 }
 0x132   :  { %v565_v50 = vadd.f32 %v564_v46, %v1216_v10  ;;  %v697_v63 = vadd.f32 %v696_v48, %v634_v54  ;;  %v650_v54 = vmul.f32 %v1230_v19, %v1230_v19 }
 0x134   :  { %v566_v2 = vadd.f32 %v565_v50, %v1222_v14  ;;  %v698_v1 = vadd.f32 %v697_v63, %v635_v62  ;;  %v485_v14 = vpop.f32.mrf.mxu2  ;;  %v652_v50 = vmul.f32 %v1242_v52, %v1242_v52 }
 0x135   :  { %v645_v34 = vmul.f32 %v485_v14, %v485_v14 }
 0x136   :  { %v699_v5 = vadd.f32 %v698_v1, %v636_v53  ;;  %v567_v57 = vadd.f32 %v566_v2, %v1228_v18  ;;  %v517_v18 = vpop.f32.mrf.mxu3  ;;  %v653_v53 = vmul.f32 %v1249_v20, %v1249_v20  ;;  %v654_v1 = vmul.f32 %v1268_v45, %v1268_v45 }
 0x138   :  { %v568_v10 = vadd.f32 %v567_v57, %v1234_v25  ;;  %v700_v59 = vadd.f32 %v699_v5, %v637_v55 }
 0x13a   :  { %v569_v61 = vadd.f32 %v568_v10, %v1240_v47  ;;  %v701_v8 = vadd.f32 %v700_v59, %v638_v58  ;;  %v656_v10 = vmul.f32 %v1290_v36, %v1290_v36 }
 0x13c   :  { %v570_v13 = vadd.f32 %v569_v61, %v1244_v23  ;;  %v702_v9 = vadd.f32 %v701_v8, %v639_v60  ;;  %v487_v32 = vpop.f32.mrf.mxu2 }
 0x13d   :  { %v646_v6 = vmul.f32 %v487_v32, %v487_v32 }
 0x13e   :  { %v571_v25 = vadd.f32 %v570_v13, %v1263_v40  ;;  %v703_v21 = vadd.f32 %v702_v9, %v640_v0  ;;  %v520_v35 = vpop.f32.mrf.mxu3  ;;  %v647_v40 = vmul.f32 %v1212_v7, %v1212_v7 }
 0x140   :  { %v572_v16 = vadd.f32 %v571_v25, %v477_v4  ;;  %v704_v17 = vadd.f32 %v703_v21, %v641_v12 }
 0x142   :  { %v705_v26 = vadd.f32 %v704_v17, %v642_v24  ;;  %v573_v47 = vadd.f32 %v572_v16, %v480_v22  ;;  %v648_v22 = vmul.f32 %v1218_v11, %v1218_v11 }
 0x144   :  { %v706_v28 = vadd.f32 %v705_v26, %v643_v27  ;;  %v574_v29 = vadd.f32 %v573_v47, %v482_v56  ;;  %v651_v56 = vmul.f32 %v1236_v30, %v1236_v30 }
 0x146   :  { %v707_v33 = vadd.f32 %v706_v28, %v644_v31  ;;  %v575_v23 = vadd.f32 %v574_v29, %v485_v14  ;;  %v658_v14 = vmul.f32 %v517_v18, %v517_v18 }
 0x148   :  { %v708_v41 = vadd.f32 %v707_v33, %v645_v34  ;;  %v576_v38 = vadd.f32 %v575_v23, %v487_v32 }
 0x14a   :  { %v577_v4 = vadd.f32 %v576_v38, %v1212_v7  ;;  %v709_v39 = vadd.f32 %v708_v41, %v646_v6  ;;  %v522_v7 = vpop.f32.mrf.mxu3 }
 0x14b   :  { %v660_v21 = vmul.f32 %v522_v7, %v522_v7 }
 0x14c   :  { %v578_v37 = vadd.f32 %v577_v4, %v1218_v11  ;;  %v710_v42 = vadd.f32 %v709_v39, %v647_v40 }
 0x14e   :  { %v579_v49 = vadd.f32 %v578_v37, %v1224_v15  ;;  %v711_v44 = vadd.f32 %v710_v42, %v648_v22 }
 0x150   :  { %v580_v46 = vadd.f32 %v579_v49, %v1230_v19  ;;  %v712_v48 = vadd.f32 %v711_v44, %v649_v43 }
 0x152   :  { %v581_v62 = vadd.f32 %v580_v46, %v1236_v30  ;;  %v713_v11 = vadd.f32 %v712_v48, %v650_v54  ;;  %v655_v30 = vmul.f32 %v1285_v3, %v1285_v3 }
 0x154   :  { %v582_v63 = vadd.f32 %v581_v62, %v1242_v52  ;;  %v714_v15 = vadd.f32 %v713_v11, %v651_v56  ;;  %v525_v52 = vpop.f32.mrf.mxu3 }
 0x156   :  { %v715_v2 = vadd.f32 %v714_v15, %v652_v50  ;;  %v583_v19 = vadd.f32 %v582_v63, %v1249_v20  ;;  %v657_v20 = vmul.f32 %v1307_v51, %v1307_v51 }
 0x158   :  { %v584_v55 = vadd.f32 %v583_v19, %v1268_v45  ;;  %v716_v5 = vadd.f32 %v715_v2, %v653_v53 }
 0x15a   :  { %v585_v57 = vadd.f32 %v584_v55, %v1285_v3  ;;  %v717_v58 = vadd.f32 %v716_v5, %v654_v1  ;;  %v659_v3 = vmul.f32 %v520_v35, %v520_v35 }
 0x15c   :  { %v586_v59 = vadd.f32 %v585_v57, %v1290_v36  ;;  %v718_v60 = vadd.f32 %v717_v58, %v655_v30  ;;  %v527_v16 = vpop.f32.mrf.mxu3  ;;  %v661_v36 = vmul.f32 %v525_v52, %v525_v52 }
 0x15d   :  { %v662_v27 = vmul.f32 %v527_v16, %v527_v16 }
 0x15e   :  { %v587_v61 = vadd.f32 %v586_v59, %v1307_v51  ;;  %v719_v45 = vadd.f32 %v718_v60, %v656_v10 }
 0x160   :  { %v588_v8 = vadd.f32 %v587_v61, %v517_v18  ;;  %v720_v0 = vadd.f32 %v719_v45, %v657_v20 }
 0x162   :  { %v721_v13 = vadd.f32 %v720_v0, %v658_v14  ;;  %v589_v9 = vadd.f32 %v588_v8, %v520_v35 }
 0x164   :  { %v722_v12 = vadd.f32 %v721_v13, %v659_v3  ;;  %v590_v25 = vadd.f32 %v589_v9, %v522_v7 }
 0x166   :  { %v723_v24 = vadd.f32 %v722_v12, %v660_v21  ;;  %v591_v17 = vadd.f32 %v590_v25, %v525_v52 }
 0x168   :  { %v724_v26 = vadd.f32 %v723_v24, %v661_v36  ;;  %v592_v47 = vadd.f32 %v591_v17, %v527_v16 }
 0x16a   :  { %v593_v28 = vrot.slane %v592_v47, 4  ;;  %v725_v29 = vadd.f32 %v724_v26, %v662_v27 }
 0x16c   :  { %v594_v51 = vadd.f32 %v593_v28, %v592_v47  ;;  %v726_v31 = vrot.slane %v725_v29, 4 }
 0x16e   :  { %v595_v32 = vrot.slane %v594_v51, 2  ;;  %v727_v18 = vadd.f32 %v726_v31, %v725_v29 }
 0x170   :  { %v728_v33 = vrot.slane %v727_v18, 2  ;;  %v596_v23 = vadd.f32 %v595_v32, %v594_v51 }
 0x172   :  { %v597_v34 = vrot.slane %v596_v23, 1  ;;  %v729_v35 = vadd.f32 %v728_v33, %v727_v18 }
 0x174   :  { %v598_v41 = vadd.f32 %v597_v34, %v596_v23  ;;  %v730_v38 = vrot.slane %v729_v35, 1 }
 0x176   :  { %732 = vst [vmem:[#allocation2] sm:$0xff] %v598_v41  ;;  %v731_v6 = vadd.f32 %v730_v38, %v729_v35 }
 0x177   :  { %744 = dma.vmem_to_hbm [thread:$0]  %s740_s25, 128, %s742_s28, [#allocation3]  }
 0x178   :  { %733 = vst [vmem:[#allocation4] sm:$0xff] %v731_v6 }
 0x179   :  { %755 = dma.vmem_to_hbm [thread:$0]  %s751_s30, 128, %s753_s6, [#allocation5]  }
 0x17a   :  { %1027 = dma.done.wait [#allocation3], 128  }
 0x17b   :  { %1028 = vsyncadd [#allocation3], 4294967168 }
 0x17c   :  { %1029 = dma.done.wait [#allocation5], 128  }
 0x17d   :  { %1030 = vsyncadd [#allocation5], 4294967168 }
 0x17e   :  { %764 = vsyncpa [#allocation3], 1 }
 0x17f   :  { %765 = vsyncpa [#allocation5], 1 }

</bundles_post_ra>
